<compile_context>
chip_gen: v5e
topology: v5e:2x2
jax: 0.10.0
libtpu: 0.0.40
codegen_flags: <defaults>
</compile_context>

<pallas_src>
import jax
import jax.numpy as jnp
from jax.experimental import pallas as pl
from jax.experimental.pallas import tpu as pltpu


def gcn_layer1_kernel(a_ref, x_ref, w_ref, b_ref, h1_ref):
    """h1_tile = relu(Â_tile @ (X @ W1) + b1)."""
    xw = jnp.dot(x_ref[...], w_ref[...], preferred_element_type=jnp.float32)  # (N, H)
    h = jnp.dot(a_ref[...], xw.astype(jnp.bfloat16),
                preferred_element_type=jnp.float32) + b_ref[...]              # (TM, H)
    h1_ref[...] = jnp.maximum(h, 0.0)
    # TODO(synk): F.dropout skipped — eval-mode (identity) semantics assumed.


def gcn_layer2_kernel(a_ref, h1_ref, w_ref, b_ref, h2_ref, out_ref):
    """h2_tile = Â_tile @ (H1 @ W2) + b2 ; out = log_softmax(relu(h2), axis=1)."""
    hw = jnp.dot(h1_ref[...].astype(jnp.bfloat16), w_ref[...],
                 preferred_element_type=jnp.float32)                          # (N, C)
    h2 = jnp.dot(a_ref[...], hw.astype(jnp.bfloat16),
                 preferred_element_type=jnp.float32) + b_ref[...]             # (TM, C)
    h2_ref[...] = h2

    z = jnp.maximum(h2, 0.0)          # ReLU after conv2, exactly as in the module
    # TODO(synk): second F.dropout skipped (eval-mode identity).
    m = jnp.max(z, axis=1, keepdims=True)
    lse = jnp.log(jnp.sum(jnp.exp(z - m), axis=1, keepdims=True)) + m
    out_ref[...] = z - lse


def gcn_forward(a_hat, x, w1, b1, w2, b2, *, tm=512):
    N, F = x.shape
    H = w1.shape[1]
    C = w2.shape[1]

    # bf16 for the memory-bound Â stream plus X / W; accumulation stays f32.
    a_bf = a_hat.astype(jnp.bfloat16)
    x_bf = x.astype(jnp.bfloat16)
    w1_bf = w1.astype(jnp.bfloat16)
    w2_bf = w2.astype(jnp.bfloat16)

    TM = N if N <= tm else tm            # row-tile height (tm is a multiple of 8)
    G = pl.cdiv(N, TM)

    row_tile = lambda d: pl.BlockSpec((TM, d), lambda i: (i, 0))
    full = lambda r, c: pl.BlockSpec((r, c), lambda i: (0, 0))

    cparams = pltpu.CompilerParams(
        dimension_semantics=("parallel",),   # shard row tiles across TCs on v7x
        vmem_limit_bytes=48 << 20,           # stays below v7x's 64 MiB physical VMEM
    )

    h1 = pl.pallas_call(
        gcn_layer1_kernel,
        out_shape=jax.ShapeDtypeStruct((N, H), jnp.float32),
        grid=(G,),
        in_specs=[row_tile(N), full(N, F), full(F, H), full(1, H)],
        out_specs=row_tile(H),
        compiler_params=cparams,
        cost_estimate=pl.CostEstimate(
            flops=2 * N * N * H + 2 * G * N * F * H,
            transcendentals=0,
            bytes_accessed=2 * N * N + 2 * G * N * F + 2 * F * H + 4 * H + 4 * N * H,
        ),
    )(a_bf, x_bf, w1_bf, b1)

    h2, out = pl.pallas_call(
        gcn_layer2_kernel,
        out_shape=(
            jax.ShapeDtypeStruct((N, C), jnp.float32),   # H2 (conv2 output, pre-ReLU)
            jax.ShapeDtypeStruct((N, C), jnp.float32),   # log_softmax output
        ),
        grid=(G,),
        in_specs=[row_tile(N), full(N, H), full(H, C), full(1, C)],
        out_specs=(row_tile(C), row_tile(C)),
        compiler_params=cparams,
        cost_estimate=pl.CostEstimate(
            flops=2 * N * N * C + 2 * G * N * H * C,
            transcendentals=N * (C + 1),
            bytes_accessed=2 * N * N + 4 * G * N * H + 2 * H * C + 4 * C + 8 * N * C,
        ),
    )(a_bf, h1, w2_bf, b2)

    # Module returns (log_softmax(x), H0, H1, H2); H0 is just the raw input features.
    return out, x, h1, h2


def build_normalized_adjacency(edge_index, num_nodes):
    """Dense D^-1/2 (A + I) D^-1/2 matching PyG GCNConv's gcn_norm.

    Messages flow src -> dst, so A[dst, src] = 1; self-loops are set (not added)
    on the diagonal so an existing (i, i) edge is not double-counted.
    """
    src, dst = edge_index[0], edge_index[1]
    a = jnp.zeros((num_nodes, num_nodes), jnp.float32)
    a = a.at[dst, src].set(1.0)
    idx = jnp.arange(num_nodes)
    a = a.at[idx, idx].set(1.0)                      # add_remaining_self_loops
    deg = jnp.sum(a, axis=1)
    d_inv_sqrt = jnp.where(deg > 0, 1.0 / jnp.sqrt(deg), 0.0)
    return a * d_inv_sqrt[:, None] * d_inv_sqrt[None, :]


def glorot(key, shape):
    fan_in, fan_out = shape
    limit = jnp.sqrt(6.0 / (fan_in + fan_out))
    return jax.random.uniform(key, shape, jnp.float32, -limit, limit)


def gcn_reference(a_hat, x, w1, b1, w2, b2):
    """Pure-JAX f32 reference of the module's forward (eval mode)."""
    h1 = jnp.maximum(a_hat @ (x @ w1) + b1, 0.0)
    h2 = a_hat @ (h1 @ w2) + b2
    z = jnp.maximum(h2, 0.0)
    return jax.nn.log_softmax(z, axis=1), x, h1, h2


if __name__ == "__main__":
    key = jax.random.PRNGKey(0)
    k_x, k_e, k_w1, k_w2 = jax.random.split(key, 4)

    # Small synthetic "Cora-like" graph.
    N = 32            # num nodes
    F_IN = 8          # num_node_features
    HID = 16          # GCN hidden size (from the module)
    C = 8             # num_classes
    E = 64            # num edges

    x = jax.random.normal(k_x, (N, F_IN), jnp.float32)
    edge_index = jax.random.randint(k_e, (2, E), 0, N, jnp.int32)
    a_hat = build_normalized_adjacency(edge_index, N)

    # Deterministic parameter init (Glorot weights, zero bias — PyG defaults).
    w1 = glorot(k_w1, (F_IN, HID))
    b1 = jnp.zeros((1, HID), jnp.float32)
    w2 = glorot(k_w2, (HID, C))
    b2 = jnp.zeros((1, C), jnp.float32)

    out, h0, h1, h2 = gcn_forward(a_hat, x, w1, b1, w2, b2)
    jax.block_until_ready((out, h0, h1, h2))

    # Sanity: log_softmax rows must exponentiate-sum to 1 (computed in f32).
    row_sums = jnp.sum(jnp.exp(out), axis=1)
    assert jnp.allclose(row_sums, 1.0, atol=1e-4), row_sums
    assert out.shape == (N, C) and h0.shape == (N, F_IN)
    assert h1.shape == (N, HID) and h2.shape == (N, C)

    # Numerics vs f32 reference (bf16 inputs -> loose tolerance).
    ref_out, _, ref_h1, ref_h2 = gcn_reference(a_hat, x, w1, b1, w2, b2)
    assert jnp.allclose(h1, ref_h1, atol=0.1), jnp.max(jnp.abs(h1 - ref_h1))
    assert jnp.allclose(h2, ref_h2, atol=0.1), jnp.max(jnp.abs(h2 - ref_h2))
    assert jnp.allclose(out, ref_out, atol=0.1), jnp.max(jnp.abs(out - ref_out))

    print("KERNEL_OK")
</pallas_src>

<mosaic_0001>
module attributes {stable_mosaic.version = 11 : i64} {
  func.func @gcn_layer1_kernel(%arg0: i32, %arg1: memref<32x32xbf16, #tpu.memory_space<vmem>>, %arg2: memref<32x8xbf16, #tpu.memory_space<vmem>>, %arg3: memref<8x16xbf16, #tpu.memory_space<vmem>>, %arg4: memref<1x16xf32, #tpu.memory_space<vmem>>, %arg5: memref<32x16xf32, #tpu.memory_space<vmem>>) attributes {dimension_semantics = [#tpu.dimension_semantics<parallel>], iteration_bounds = array<i64: 1>, scalar_prefetch = 0 : i64, scratch_operands = 0 : i64, tpu.core_type = #tpu.core_type<tc>, window_params = [{transform_indices = @transform_0, window_bounds = array<i64: 32, 32>}, {pipeline_mode = #tpu.pipeline_mode<synchronous>, transform_indices = @transform_1, window_bounds = array<i64: 32, 8>}, {pipeline_mode = #tpu.pipeline_mode<synchronous>, transform_indices = @transform_2, window_bounds = array<i64: 8, 16>}, {pipeline_mode = #tpu.pipeline_mode<synchronous>, transform_indices = @transform_3, window_bounds = array<i64: 1, 16>}, {transform_indices = @transform_4, window_bounds = array<i64: 32, 16>}]} {
    %c0 = arith.constant 0 : index
    %c0_0 = arith.constant 0 : index
    %0 = vector.load %arg2[%c0, %c0_0] : memref<32x8xbf16, #tpu.memory_space<vmem>>, vector<32x8xbf16>
    %c0_1 = arith.constant 0 : index
    %c0_2 = arith.constant 0 : index
    %1 = vector.load %arg3[%c0_1, %c0_2] : memref<8x16xbf16, #tpu.memory_space<vmem>>, vector<8x16xbf16>
    %cst = arith.constant dense<0.000000e+00> : vector<32x16xf32>
    %2 = tpu.matmul %0, %1, %cst {dimension_numbers = #tpu.dot_dimension_numbers<[1], [0], [0], [1], [0, 0, 1, 1], [], []>} : vector<32x8xbf16>, vector<8x16xbf16>, vector<32x16xf32> -> vector<32x16xf32>
    %c0_3 = arith.constant 0 : index
    %c0_4 = arith.constant 0 : index
    %3 = vector.load %arg1[%c0_3, %c0_4] : memref<32x32xbf16, #tpu.memory_space<vmem>>, vector<32x32xbf16>
    %4 = arith.truncf %2 : vector<32x16xf32> to vector<32x16xbf16>
    %cst_5 = arith.constant dense<0.000000e+00> : vector<32x16xf32>
    %5 = tpu.matmul %3, %4, %cst_5 {dimension_numbers = #tpu.dot_dimension_numbers<[1], [0], [0], [1], [0, 0, 1, 1], [], []>} : vector<32x32xbf16>, vector<32x16xbf16>, vector<32x16xf32> -> vector<32x16xf32>
    %c0_6 = arith.constant 0 : index
    %c0_7 = arith.constant 0 : index
    %6 = vector.load %arg4[%c0_6, %c0_7] : memref<1x16xf32, #tpu.memory_space<vmem>>, vector<1x16xf32>
    %7 = vector.broadcast %6 : vector<1x16xf32> to vector<32x16xf32>
    %8 = arith.addf %5, %7 : vector<32x16xf32>
    %cst_8 = arith.constant 0.000000e+00 : f32
    %9 = vector.broadcast %cst_8 : f32 to vector<32x16xf32>
    %10 = arith.maximumf %8, %9 : vector<32x16xf32>
    %c0_9 = arith.constant 0 : index
    %c0_10 = arith.constant 0 : index
    %11 = vector.load %arg5[%c0_9, %c0_10] : memref<32x16xf32, #tpu.memory_space<vmem>>, vector<32x16xf32>
    tpu.vector_store %arg5[%c0_9, %c0_10], %10 {strides = array<i32>} : memref<32x16xf32, #tpu.memory_space<vmem>>, vector<32x16xf32>,
    return
  }
  func.func @transform_0(%arg0: i32) -> (i32, i32) {
    %c0_i32 = arith.constant 0 : i32
    %c0_i32_0 = arith.constant 0 : i32
    return %arg0, %c0_i32 : i32, i32
  }
  func.func @transform_1(%arg0: i32) -> (i32, i32) {
    %c0_i32 = arith.constant 0 : i32
    %c0_i32_0 = arith.constant 0 : i32
    %c0_i32_1 = arith.constant 0 : i32
    return %c0_i32, %c0_i32_0 : i32, i32
  }
  func.func @transform_2(%arg0: i32) -> (i32, i32) {
    %c0_i32 = arith.constant 0 : i32
    %c0_i32_0 = arith.constant 0 : i32
    %c0_i32_1 = arith.constant 0 : i32
    return %c0_i32, %c0_i32_0 : i32, i32
  }
  func.func @transform_3(%arg0: i32) -> (i32, i32) {
    %c0_i32 = arith.constant 0 : i32
    %c0_i32_0 = arith.constant 0 : i32
    %c0_i32_1 = arith.constant 0 : i32
    return %c0_i32, %c0_i32_0 : i32, i32
  }
  func.func @transform_4(%arg0: i32) -> (i32, i32) {
    %c0_i32 = arith.constant 0 : i32
    %c0_i32_0 = arith.constant 0 : i32
    return %arg0, %c0_i32 : i32, i32
  }
}

</mosaic_0001>

<bundles_post_ra>
// kernel: tpu_custom_call.1
= control target key start
LH: loop header
LB: loop body
LE: loop exit
PB: predicated region body
PF: predicated region fallthrough
CT: control target
= control target key end

     0   :  { %vm40_vm0 = vcmask 1043456   ;;  %vm33_vm1 = vcmask 64512   ;;  %vm83_vm2 = vcmask 261120   ;;  %vm113_vm3 = vcmask 130048   ;;  %s205_s2 = inlined_call_operand.vmem [shape: bf16[8,16], index: 2, kind: input, shape index: {}]   ;;  %s206_s1 = inlined_call_operand.vmem [shape: bf16[32,8], index: 1, kind: input, shape index: {}]   ;;  %s207_s3 = inlined_call_operand.vmem [shape: f32[1,16], index: 3, kind: input, shape index: {}]   ;;  %s208_s0 = inlined_call_operand.vmem [shape: bf16[32,32], index: 0, kind: input, shape index: {}]   ;;  %s209_s4 = inlined_call_operand.vmem [shape: f32[32,16], index: 4, kind: output, shape index: {}]  }
   0x1   :  { %v22_v0 = vld [vmem:[%s205_s2] sm:$0xf]  ;;  %v143_v2 = vld [vmem:[%s206_s1 + $0x8] sm:$0xff] }
   0x2   :  { %v42_v1 = vsel %vm40_vm0, %v22_v0, 0  ;;  %v142_v3 = vld [vmem:[%s206_s1] sm:$0xff]  ;;  %v145_v11 = vld [vmem:[%s208_s0 + $0x8] sm:$0xff] }
   0x3   :  { %146 = vmatpush.bf16.msra.mxu3 %v42_v1  ;;  %51 = vmatpush.bf16.msra.mxu0 %v42_v1  ;;  %v144_v10 = vld [vmem:[%s208_s0] sm:$0xff] }
   0x4   :  { %v149_v12 = vld [vmem:[%s207_s3] ss:$0 sm:$0xff] }
   0x6   :  { %131 = vmatmul.msk.bf16.vlgmr.msra.gmra.mxu3 %vm33_vm1, %v143_v2  ;;  %130 = vmatmul.msk.bf16.vlgmr.msra.gmra.mxu0 %vm33_vm1, %v142_v3 }
  0x83   :  { %v53_v4 = vpop.f32.mrf.mxu0 }
  0x89   :  { %v58_v5 = vpop.f32.mrf.mxu3 }
  0x8b   :  { %v55_v8 = vpop.f32.mrf.mxu0 }
  0x8c   :  { %v67_v9 = vpack.c.bf16 %v55_v8, %v53_v4 }
  0x91   :  { %v60_v6 = vpop.f32.mrf.mxu3 }
  0x92   :  { %v68_v7 = vpack.c.bf16 %v60_v6, %v58_v5 }
  0x94   :  { %96 = vmatpush.bf16.msra.mxu1 %v68_v7  ;;  %147 = vmatpush.bf16.msra.mxu2 %v68_v7 }
  0x98   :  { %97 = vmatpush.bf16.msra.mxu1 %v67_v9  ;;  %148 = vmatpush.bf16.msra.mxu2 %v67_v9 }
  0x9b   :  { %140 = vmatmul.msk.bf16.vlgmr.msra.gmra.mxu1 %vm83_vm2, %v144_v10  ;;  %141 = vmatmul.msk.bf16.vlgmr.msra.gmra.mxu2 %vm83_vm2, %v145_v11 }
 0x118   :  { %v99_v13 = vpop.f32.mrf.mxu1 }
 0x119   :  { %v100_v14 = vadd.f32 %v149_v12, %v99_v13 }
 0x11b   :  { %v109_v15 = vmax.f32 %v100_v14, 0.0 }
 0x11d   :  { %114 = vst.msk [vmem:[%s209_s4] sm:$0xff] %vm113_vm3, %v109_v15 }
 0x11e   :  { %v104_v16 = vpop.f32.mrf.mxu2 }
 0x11f   :  { %v105_v17 = vadd.f32 %v149_v12, %v104_v16 }
 0x120   :  { %v101_v18 = vpop.f32.mrf.mxu1 }
 0x121   :  { %v111_v19 = vmax.f32 %v105_v17, 0.0  ;;  %v102_v20 = vadd.f32 %v149_v12, %v101_v18 }
 0x123   :  { %116 = vst.msk [vmem:[%s209_s4 + $0x10] sm:$0xff] %vm113_vm3, %v111_v19  ;;  %v110_v21 = vmax.f32 %v102_v20, 0.0 }
 0x125   :  { %115 = vst.msk [vmem:[%s209_s4 + $0x8] sm:$0xff] %vm113_vm3, %v110_v21 }
 0x126   :  { %v106_v22 = vpop.f32.mrf.mxu2 }
 0x127   :  { %v107_v23 = vadd.f32 %v149_v12, %v106_v22 }
 0x129   :  { %v112_v24 = vmax.f32 %v107_v23, 0.0 }
 0x12b   :  { %117 = vst.msk [vmem:[%s209_s4 + $0x18] sm:$0xff] %vm113_vm3, %v112_v24 }

</bundles_post_ra>
